<compile_context>
chip_gen: v6e
topology: v6e:2x2x1
jax: 0.10.0
libtpu: 0.0.40
codegen_flags: <defaults>
</compile_context>

<pallas_src>
import functools

import jax
import jax.numpy as jnp
from jax.experimental import pallas as pl
from jax.experimental.pallas import tpu as pltpu


def _nce_kernel(pred_ref, labels_ref, out_ref, *, n_total, tile_n, num_classes, scale):
    # pred_ref  : VMEM (tile_n, C)  logits (native dtype)
    # labels_ref: VMEM (tile_n, 1)  int32 class indices
    # out_ref   : VMEM (1, 1) f32   resident accumulator -> final scalar loss
    i = pl.program_id(0)
    last = pl.num_programs(0) - 1

    @pl.when(i == 0)
    def _init():
        out_ref[...] = jnp.zeros_like(out_ref)

    pred = pred_ref[...].astype(jnp.float32)                 # (tile_n, C)
    labels = labels_ref[...]                                 # (tile_n, 1) int32

    # Numerically stable log-sum-exp per row; exp is the only full-tile EUP op.
    m = jnp.max(pred, axis=1, keepdims=True)                 # (tile_n, 1)
    e = jnp.exp(pred - m)                                    # (tile_n, C)
    lse = m + jnp.log(jnp.sum(e, axis=1, keepdims=True))     # (tile_n, 1)

    # Numerator: -log_softmax at the label column == lse - pred[label].
    class_ids = jax.lax.broadcasted_iota(jnp.int32, pred.shape, 1)       # (tile_n, C)
    pred_label = jnp.sum(
        jnp.where(class_ids == labels, pred, 0.0), axis=1, keepdims=True)
    num = lse - pred_label                                   # (tile_n, 1)

    # Denominator: -sum_j log_softmax == C*lse - rowsum(pred).
    den = jnp.float32(num_classes) * lse - jnp.sum(pred, axis=1, keepdims=True)

    if n_total % tile_n != 0:
        # Mask rows beyond the true batch size (only the last tile is partial).
        row_ids = i * tile_n + jax.lax.broadcasted_iota(jnp.int32, (tile_n, 1), 0)
        valid = row_ids < n_total
        # Guard den so padded (garbage) rows cannot produce Inf/NaN in the divide.
        num = jnp.where(valid, num, 0.0)
        den = jnp.where(valid, den, 1.0)

    nce = num / den                                          # (tile_n, 1)
    out_ref[...] += jnp.sum(nce, keepdims=True)              # running f32 sum, (1, 1)

    @pl.when(i == last)
    def _finalize():
        out_ref[...] = out_ref[...] * jnp.float32(scale / n_total)


def normalized_cross_entropy(pred, labels, num_classes, scale=1.0, tile_n=None):
    """Pallas TPU implementation of NormalizedCrossEntropy.forward (returns a scalar)."""
    n, c = pred.shape
    assert c == num_classes

    if tile_n is None:
        # Budget ~4 MiB per (double-buffered) pred tile; lane dim pads to >= 128.
        c_padded = max(c, 128)
        bytes_per_row = c_padded * jnp.dtype(pred.dtype).itemsize
        budget = 4 * 1024 * 1024
        tile_n = max(8, min(512, (budget // bytes_per_row) // 8 * 8))
    # Never use a tile taller than the (8-rounded) batch.
    tile_n = int(min(tile_n, max(8, ((n + 7) // 8) * 8)))

    num_tiles = pl.cdiv(n, tile_n)
    labels2d = labels.astype(jnp.int32).reshape(n, 1)

    kernel = functools.partial(
        _nce_kernel,
        n_total=n,
        tile_n=tile_n,
        num_classes=c,
        scale=float(scale),
    )

    itemsize = jnp.dtype(pred.dtype).itemsize
    cost = pl.CostEstimate(
        flops=6 * n * c,
        transcendentals=n * c,               # one exp per element
        bytes_accessed=n * c * itemsize + n * 4 + 4,
    )

    out = pl.pallas_call(
        kernel,
        out_shape=jax.ShapeDtypeStruct((1, 1), jnp.float32),
        grid=(num_tiles,),
        in_specs=[
            pl.BlockSpec((tile_n, c), lambda i: (i, 0)),   # pred tile
            pl.BlockSpec((tile_n, 1), lambda i: (i, 0)),   # labels tile
        ],
        out_specs=pl.BlockSpec((1, 1), lambda i: (0, 0)),  # resident accumulator
        compiler_params=pltpu.CompilerParams(
            dimension_semantics=("arbitrary",),            # reduction-carried axis
        ),
        cost_estimate=cost,
    )(pred, labels2d)
    return out[0, 0]


def _reference(pred, labels, num_classes, scale=1.0):
    lp = jax.nn.log_softmax(pred.astype(jnp.float32), axis=1)
    oh = jax.nn.one_hot(labels, num_classes, dtype=jnp.float32)
    nce = -jnp.sum(oh * lp, axis=1) / (-jnp.sum(lp, axis=1))
    return scale * jnp.mean(nce)


if __name__ == "__main__":
    num_classes = 10
    batch = 20          # deliberately not a multiple of tile_n -> exercises masking
    scale = 1.0

    key = jax.random.PRNGKey(0)
    k1, k2 = jax.random.split(key)
    pred = jax.random.normal(k1, (batch, num_classes), dtype=jnp.float32)
    labels = jax.random.randint(k2, (batch,), 0, num_classes, dtype=jnp.int32)

    # tile_n=8 so the small demo exercises multiple grid steps (init/acc/finalize)
    # plus a partial last tile.
    out = normalized_cross_entropy(pred, labels, num_classes, scale, tile_n=8)
    out = jax.block_until_ready(out)

    ref = _reference(pred, labels, num_classes, scale)
    assert jnp.allclose(out, ref, rtol=1e-5, atol=1e-5), (out, ref)

    print("KERNEL_OK")
</pallas_src>

<mosaic_0001>
module attributes {stable_mosaic.version = 11 : i64} {
  func.func @_nce_kernel(%arg0: i32, %arg1: memref<8x10xf32, #tpu.memory_space<vmem>>, %arg2: memref<8x1xi32, #tpu.memory_space<vmem>>, %arg3: memref<1x1xf32, #tpu.memory_space<vmem>>) attributes {dimension_semantics = [#tpu.dimension_semantics<arbitrary>], iteration_bounds = array<i64: 3>, scalar_prefetch = 0 : i64, scratch_operands = 0 : i64, tpu.core_type = #tpu.core_type<tc>, window_params = [{transform_indices = @transform_0, window_bounds = array<i64: 8, 10>}, {transform_indices = @transform_1, window_bounds = array<i64: 8, 1>}, {pipeline_mode = #tpu.pipeline_mode<synchronous>, transform_indices = @transform_2, window_bounds = array<i64: 1, 1>}]} {
    %c0_i32 = arith.constant 0 : i32
    %0 = arith.cmpi eq, %arg0, %c0_i32 : i32
    %1 = arith.extui %0 : i1 to i32
    %c0_i32_0 = arith.constant 0 : i32
    %2 = arith.cmpi ne, %1, %c0_i32_0 : i32
    scf.if %2 {
      %cst_17 = arith.constant 0.000000e+00 : f32
      %49 = vector.broadcast %cst_17 : f32 to vector<1x1xf32>
      %c0_18 = arith.constant 0 : index
      %c0_19 = arith.constant 0 : index
      %50 = vector.load %arg3[%c0_18, %c0_19] : memref<1x1xf32, #tpu.memory_space<vmem>>, vector<1x1xf32>
      tpu.vector_store %arg3[%c0_18, %c0_19], %49 {strides = array<i32>} : memref<1x1xf32, #tpu.memory_space<vmem>>, vector<1x1xf32>,
    } else {
    }
    %c0 = arith.constant 0 : index
    %c0_1 = arith.constant 0 : index
    %3 = vector.load %arg1[%c0, %c0_1] : memref<8x10xf32, #tpu.memory_space<vmem>>, vector<8x10xf32>
    %c0_2 = arith.constant 0 : index
    %c0_3 = arith.constant 0 : index
    %4 = vector.load %arg2[%c0_2, %c0_3] : memref<8x1xi32, #tpu.memory_space<vmem>>, vector<8x1xi32>
    %cst = arith.constant dense<0xFF800000> : vector<8xf32>
    %5 = vector.multi_reduction <maximumf>, %3, %cst [1] : vector<8x10xf32> to vector<8xf32>
    %6 = vector.shape_cast %5 : vector<8xf32> to vector<8x1xf32>
    %7 = vector.broadcast %6 : vector<8x1xf32> to vector<8x10xf32>
    %8 = arith.subf %3, %7 : vector<8x10xf32>
    %9 = math.exp %8 : vector<8x10xf32>
    %cst_4 = arith.constant dense<0.000000e+00> : vector<8xf32>
    %10 = vector.multi_reduction <add>, %9, %cst_4 [1] : vector<8x10xf32> to vector<8xf32>
    %11 = vector.shape_cast %10 : vector<8xf32> to vector<8x1xf32>
    %12 = math.log %11 : vector<8x1xf32>
    %13 = arith.addf %6, %12 : vector<8x1xf32>
    %14 = tpu.iota {dimensions = array<i32: 1>} : vector<8x10xi32>
    %15 = vector.broadcast %4 : vector<8x1xi32> to vector<8x10xi32>
    %16 = arith.cmpi eq, %14, %15 : vector<8x10xi32>
    %cst_5 = arith.constant 0.000000e+00 : f32
    %17 = vector.broadcast %cst_5 : f32 to vector<8x10xf32>
    %18 = arith.select %16, %3, %17 : vector<8x10xi1>, vector<8x10xf32>
    %cst_6 = arith.constant dense<0.000000e+00> : vector<8xf32>
    %19 = vector.multi_reduction <add>, %18, %cst_6 [1] : vector<8x10xf32> to vector<8xf32>
    %20 = vector.shape_cast %19 : vector<8xf32> to vector<8x1xf32>
    %21 = arith.subf %13, %20 : vector<8x1xf32>
    %cst_7 = arith.constant 1.000000e+01 : f32
    %22 = vector.broadcast %cst_7 : f32 to vector<8x1xf32>
    %23 = arith.mulf %22, %13 : vector<8x1xf32>
    %cst_8 = arith.constant dense<0.000000e+00> : vector<8xf32>
    %24 = vector.multi_reduction <add>, %3, %cst_8 [1] : vector<8x10xf32> to vector<8xf32>
    %25 = vector.shape_cast %24 : vector<8xf32> to vector<8x1xf32>
    %26 = arith.subf %23, %25 : vector<8x1xf32>
    %c8_i32 = arith.constant 8 : i32
    %27 = arith.muli %arg0, %c8_i32 : i32
    %28 = tpu.iota {dimensions = array<i32: 0>} : vector<8x1xi32>
    %29 = vector.broadcast %27 : i32 to vector<8x1xi32>
    %30 = arith.addi %29, %28 : vector<8x1xi32>
    %c20_i32 = arith.constant 20 : i32
    %31 = vector.broadcast %c20_i32 : i32 to vector<8x1xi32>
    %32 = arith.cmpi slt, %30, %31 : vector<8x1xi32>
    %cst_9 = arith.constant 0.000000e+00 : f32
    %33 = vector.broadcast %cst_9 : f32 to vector<8x1xf32>
    %34 = arith.select %32, %21, %33 : vector<8x1xi1>, vector<8x1xf32>
    %cst_10 = arith.constant 1.000000e+00 : f32
    %35 = vector.broadcast %cst_10 : f32 to vector<8x1xf32>
    %36 = arith.select %32, %26, %35 : vector<8x1xi1>, vector<8x1xf32>
    %37 = arith.divf %34, %36 : vector<8x1xf32>
    %c0_11 = arith.constant 0 : index
    %c0_12 = arith.constant 0 : index
    %38 = vector.load %arg3[%c0_11, %c0_12] : memref<1x1xf32, #tpu.memory_space<vmem>>, vector<1x1xf32>
    %39 = vector.shape_cast %37 : vector<8x1xf32> to vector<1x8x1xf32>
    %cst_13 = arith.constant dense<0.000000e+00> : vector<1xf32>
    %40 = vector.multi_reduction <add>, %39, %cst_13 [1, 2] : vector<1x8x1xf32> to vector<1xf32>
    %41 = vector.shape_cast %40 : vector<1xf32> to vector<1x1x1xf32>
    %42 = vector.extract %41[0, 0, 0] : f32 from vector<1x1x1xf32>
    %43 = vector.broadcast %42 : f32 to vector<1x1xf32>
    %44 = arith.addf %38, %43 : vector<1x1xf32>
    %c0_14 = arith.constant 0 : index
    %c0_15 = arith.constant 0 : index
    %45 = vector.load %arg3[%c0_14, %c0_15] : memref<1x1xf32, #tpu.memory_space<vmem>>, vector<1x1xf32>
    tpu.vector_store %arg3[%c0_14, %c0_15], %44 {strides = array<i32>} : memref<1x1xf32, #tpu.memory_space<vmem>>, vector<1x1xf32>,
    %c2_i32 = arith.constant 2 : i32
    %46 = arith.cmpi eq, %arg0, %c2_i32 : i32
    %47 = arith.extui %46 : i1 to i32
    %c0_i32_16 = arith.constant 0 : i32
    %48 = arith.cmpi ne, %47, %c0_i32_16 : i32
    scf.if %48 {
      %c0_17 = arith.constant 0 : index
      %c0_18 = arith.constant 0 : index
      %49 = vector.load %arg3[%c0_17, %c0_18] : memref<1x1xf32, #tpu.memory_space<vmem>>, vector<1x1xf32>
      %cst_19 = arith.constant 5.000000e-02 : f32
      %50 = vector.broadcast %cst_19 : f32 to vector<1x1xf32>
      %51 = arith.mulf %49, %50 : vector<1x1xf32>
      %c0_20 = arith.constant 0 : index
      %c0_21 = arith.constant 0 : index
      %52 = vector.load %arg3[%c0_20, %c0_21] : memref<1x1xf32, #tpu.memory_space<vmem>>, vector<1x1xf32>
      tpu.vector_store %arg3[%c0_20, %c0_21], %51 {strides = array<i32>} : memref<1x1xf32, #tpu.memory_space<vmem>>, vector<1x1xf32>,
    } else {
    }
    return
  }
  func.func @transform_0(%arg0: i32) -> (i32, i32) {
    %c0_i32 = arith.constant 0 : i32
    %c0_i32_0 = arith.constant 0 : i32
    return %arg0, %c0_i32 : i32, i32
  }
  func.func @transform_1(%arg0: i32) -> (i32, i32) {
    %c0_i32 = arith.constant 0 : i32
    %c0_i32_0 = arith.constant 0 : i32
    return %arg0, %c0_i32 : i32, i32
  }
  func.func @transform_2(%arg0: i32) -> (i32, i32) {
    %c0_i32 = arith.constant 0 : i32
    %c0_i32_0 = arith.constant 0 : i32
    %c0_i32_1 = arith.constant 0 : i32
    return %c0_i32, %c0_i32_0 : i32, i32
  }
}

</mosaic_0001>

<bundles_post_ra>
// kernel: tpu_custom_call.1
= control target key start
LH: loop header
LB: loop body
LE: loop exit
PB: predicated region body
PF: predicated region fallthrough
CT: control target
= control target key end

     0   :  { %7 = vsyncpa [#allocation3], 0  ;;  %s365_s9 = smov 0   ;;  %s405_s0 = inlined_call_operand.vmem [shape: f32[20,10], index: 0, kind: input, shape index: {}]   ;;  %s406_s1 = inlined_call_operand.vmem [shape: s32[20,1], index: 1, kind: input, shape index: {}]   ;;  %s407_s2 = inlined_call_operand.hbm [shape: f32[1,1], index: 2, kind: output, shape index: {}]  }
   0x1 LB: > { %s371_s10 = sadd.s32 4294967295, %s345_s9   ;;  %p275_p0 = scmp.ge.s32.totalorder %s345_s9, 1  ;;  %s345_s9 = sphi %s365_s9, %s13_s9  }
   0x2   : > { %p116_p1 = scmp.lt.s32.totalorder %s345_s9, 4 }
   0x4   : > { %p117_p2 = pnand %p275_p0, %p116_p1 }
   0x5   : > { %p136_p3 = scmp.lt.s32.totalorder (!%p117_p2), %s371_s10, 2  ;;  %p278_p4 = scmp.ne.s32.totalorder (!%p117_p2), %s371_s10, 0 }
   0x6   : > { %120 = sbr.rel (%p117_p2) target bundleno = 585 (0x249), region = 28 }
   0xb   : > { %s137_s11 = scalar_select %p136_p3, %s371_s10, 2 }
   0xc   : > { %147 = sbr.rel (%p278_p4) target bundleno = 19 (0x13), region = 32 }
   0xd   : > { %s276_s12 = sshll.u32 %s137_s11, 3 }
   0xe   : > { %s139_s15 = scalar_lea.vmem %s405_s0, %s276_s12  ;;  %s143_s18 = scalar_lea.vmem %s406_s1, %s276_s12 }
  0x11   : > { %vm148_vm0 = vcmask 0   ;;  %v347_v0 = vmov 0.0  }
  0x12   : > { %149 = vst.msk [vmem:[#allocation2] sm:$0x1] %vm148_vm0, %v347_v0 }
  0x13 PF: > { %v150_v1 = vld [vmem:[%s139_s15] sm:$0xff]  ;;  %vm152_vm1 = vcmask 80896   ;;  %v348_v3 = vmov 0   ;;  %v165_v8 = vlaneseq  ;;  %s279_s19 = sshll.u32 %s371_s10, 3  ;;  %vm192_vm4 = vcmask 7168   ;;  %p280_p5 = scmp.ne.s32.totalorder %s371_s10, 2 }
  0x14   : > { %v153_v2 = vsel %vm152_vm1, %v150_v1, -inf  ;;  %304 = vset.pattern.permute.xlu0 %v348_v3  ;;  %v151_v4 = vld [vmem:[%s143_s18] sm:$0xff]  ;;  %v177_v13 = vsel %vm152_vm1, %v150_v1, 0.0  ;;  %v184_v20 = vstv %s279_s19  ;;  %vm205_vm5 = vcmask 0  }
  0x15   : > { %154 = vmax.xlane.f32.xlu0 %v153_v2  ;;  %v166_v9 = vand.u32 127, %v165_v8  ;;  %v183_v18 = vshrl.u32 %v165_v8, 7 }
  0x17   : > { %v185_v22 = vadd.s32 %v184_v20, %v183_v18 }
  0x19   : > { %vm186_vm3 = vcmp.lt.s32.totalorder %v185_v22, 20  ;;  %v191_v40 = vld [vmem:[#allocation2] sm:$0x1] }
  0x2b   : > { %168 = vperm.xlu0 %304, %v151_v4  }
  0x9e   : > { %v155_v5 = vpop.xlane.xlu0 %154 }
  0x9f   : > { %v156_v6 = vsub.f32 %v150_v1, %v155_v5 }
  0xa1   : > { %v157_v7 = vmul.f32 1.442695, %v156_v6 }
  0xa3   : > { %305 = vpow2.f32 %v157_v7 }
  0xa6   : > { %v169_v10 = vpop.permute.xlu0 %168 }
  0xa7   : > { %vm170_vm2 = vcmp.eq.s32.totalorder %v166_v9, %v169_v10 }
  0xa8   : > { %v171_v14 = vsel %vm170_vm2, %v150_v1, 0.0 }
  0xa9   : > { %v172_v15 = vsel %vm152_vm1, %v171_v14, 0.0 }
  0xb0   : > { %v306_v11 = vpop.eup %305 }
  0xb1   : > { %v159_v12 = vsel %vm152_vm1, %v306_v11, 0.0 }
  0xb2   : > { %160 = vadd.xlane.f32.xlu1 %v159_v12 }
  0xb6   : > { %178 = vadd.xlane.f32.xlu1 %v177_v13 }
  0xba   : > { %173 = vadd.xlane.f32.xlu1 %v172_v15 }
 0x13b   : > { %v161_v16 = vpop.xlane.xlu1 %160 }
 0x13c   : > { %307 = vlog2.f32 %v161_v16 }
 0x13f   : > { %v179_v24 = vpop.xlane.xlu1 %178 }
 0x143   : > { %v174_v27 = vpop.xlane.xlu1 %173 }
 0x149   : > { %v308_v17 = vpop.eup %307 }
 0x14a   : > { %v163_v19 = vmul.f32 0.6931472, %v308_v17 }
 0x14c   : > { %v164_v21 = vadd.f32 %v163_v19, %v155_v5 }
 0x14e   : > { %v176_v23 = vmul.f32 10.0, %v164_v21  ;;  %v175_v28 = vsub.f32 %v164_v21, %v174_v27 }
 0x150   : > { %v180_v25 = vsub.f32 %v176_v23, %v179_v24  ;;  %v187_v30 = vsel %vm186_vm3, %v175_v28, 0.0 }
 0x152   : > { %v188_v26 = vsel %vm186_vm3, %v180_v25, 1.0 }
 0x153   : > { %309 = vrcp.f32 %v188_v26 }
 0x160   : > { %v310_v29 = vpop.eup %309 }
 0x161   : > { %v190_v31 = vmul.f32 %v310_v29, %v187_v30 }
 0x163   : > { %v193_v32 = vsel %vm192_vm4, %v190_v31, 0.0 }
 0x164   : > { %194 = vadd.xlane.f32.xlu1 %v193_v32 }
 0x1ed   : > { %v195_v33 = vpop.xlane.xlu1 %194 }
 0x1ee   : > { %v196_v34 = vrot.slane %v195_v33, 4 }
 0x1f0   : > { %v197_v35 = vadd.f32 %v196_v34, %v195_v33 }
 0x1f2   : > { %v198_v36 = vrot.slane %v197_v35, 2 }
 0x1f4   : > { %v199_v37 = vadd.f32 %v198_v36, %v197_v35 }
 0x1f6   : > { %v200_v38 = vrot.slane %v199_v37, 1 }
 0x1f8   : > { %v201_v39 = vadd.f32 %v200_v38, %v199_v37 }
 0x1fa   : > { %285 = vpush %v201_v39 }
 0x22b   : > { %s286_s20 = spop %285  ;;  %210 = sbr.rel (%p280_p5) target bundleno = 570 (0x23a), region = 36 }
 0x22c   : > { %v203_v41 = vstv %s286_s20 }
 0x22d   : > { %v204_v42 = vadd.f32 %v203_v41, %v191_v40 }
 0x22f   : > { %206 = vst.msk [vmem:[#allocation2] sm:$0x1] %vm205_vm5, %v204_v42 }
 0x236   : > { %v211_v43 = vld [vmem:[#allocation2] sm:$0x1] }
 0x237   : > { %v212_v44 = vmul.f32 0.05, %v211_v43 }
 0x239   : > { %213 = vst.msk [vmem:[#allocation2] sm:$0x1] %vm205_vm5, %v212_v44 }
 0x23a PF: > { %p291_p6 = scmp.eq.s32.totalorder %s371_s10, 2  ;;  %s349_s21 = smov [#allocation2]  }
 0x23b   : > { %s221_s22 = sshll.u32 %s349_s21, 4  ;;  %s222_s22 = int_to_ptr.vmem [resolvable:$true] %s221_s22 }
 0x23c   : > { %s311_s23 = scalar_lea.vmem %s222_s22, 16  ;;  %s317_s24 = scalar_lea.vmem %s222_s22, 32 }
 0x23d   : > { %p312_p7 = scmp.ne.s32.totalorder %s222_s22, %s311_s23  ;;  %p318_p10 = scmp.lt.s32.totalorder %s222_s22, %s222_s22 }
 0x23e   : > { %p319_p11 = scmp.lt.s32.totalorder %s317_s24, %s311_s23 }
 0x23f   : > { %p313_p8 = pnand %p312_p7, %p291_p6 }
 0x240   : > { %p320_p12 = por %p319_p11, %p318_p10 }
 0x241   : > { %p314_p9 = pneg %p313_p8 }
 0x243   : > { %p321_p13 = pnand %p320_p12, %p314_p9 }
 0x245   : > { %324 = shalt.err (!%p321_p13)
}
 0x246   : > { %288 = dma.vmem_to_hbm [thread:$0]  (%p291_p6), %s222_s22, 16, %s407_s2, [#allocation3]  }
 0x247   : > { %340 = dma.done.wait (%p291_p6), [#allocation3], 16  }
 0x248   : > { %342 = vsyncadd (%p291_p6), [#allocation3], 4294967280 }
 0x249 PF: > { %s13_s9 = sadd.s32 1, %s345_s9  }
 0x24a   : > { %p10_p0 = scmp.ge.s32.totalorder %s13_s9, 5  }
 0x24c   :  { %12 = sbr.rel (!%p10_p0) target bundleno = 1 (0x1), region = 66 }
 0x251   :  { %234 = vsyncpa [#allocation3], 1 }
 0x252   :  { %236 = vsyncpa [#allocation3 + $0x1], 1 }

</bundles_post_ra>
